<compile_context>
chip_gen: v6e
topology: v6e:2x2x1
jax: 0.10.0
libtpu: 0.0.40
codegen_flags: <defaults>
</compile_context>

<pallas_src>
import jax
import jax.numpy as jnp
import numpy as np
from jax.experimental import pallas as pl
from jax.experimental.pallas import tpu as pltpu


def mlp_kernel(x_ref, w1_ref, b1_ref, w2_ref, b2_ref, o_ref):
    # x: (tm, C) bf16 | w1: (C, Hp) bf16 | b1: (1, Hp) f32
    # w2: (Hp, Co) bf16 | b2: (1, Co) f32 | o: (tm, Co)
    h = jnp.dot(x_ref[...], w1_ref[...], preferred_element_type=jnp.float32)
    h = jnp.maximum(h + b1_ref[...], 0.0)                      # bias + ReLU in f32
    o = jnp.dot(h.astype(jnp.bfloat16), w2_ref[...],
                preferred_element_type=jnp.float32) + b2_ref[...]
    o_ref[...] = o.astype(o_ref.dtype)


def _round_up(v, m):
    return ((v + m - 1) // m) * m


def _choose_tm(M, tm_target):
    """Largest row tile <= tm_target (multiple of 8) that keeps grid >= 2 when
    possible, so the 'parallel' axis can shard across both v7x TensorCores."""
    Mr = _round_up(max(M, 8), 8)
    tm = min(tm_target, Mr)
    if Mr > 8:
        n_steps = max(2, pl.cdiv(Mr, tm))
        tm = _round_up(pl.cdiv(Mr, n_steps), 8)
    return tm


def prepare_params(params):
    """One-time (hoisted out of the hot path) padded / bf16 weight prep.

    Hidden dim is zero-padded up to a multiple of 128 lanes.  Exact: ReLU(0)=0
    and the corresponding rows of w2 are zero, so padded lanes contribute 0.
    """
    w1, b1, w2, b2 = params["w1"], params["b1"], params["w2"], params["b2"]
    C, H = w1.shape
    Co = w2.shape[1]
    Hp = max(128, _round_up(H, 128))
    w1p = jnp.zeros((C, Hp), jnp.bfloat16).at[:, :H].set(w1.astype(jnp.bfloat16))
    b1p = jnp.zeros((1, Hp), jnp.float32).at[:, :H].set(
        b1.reshape(1, H).astype(jnp.float32))
    w2p = jnp.zeros((Hp, Co), jnp.bfloat16).at[:H, :].set(w2.astype(jnp.bfloat16))
    b2p = b2.reshape(1, Co).astype(jnp.float32)
    return {"w1p": w1p, "b1p": b1p, "w2p": w2p, "b2p": b2p}


def mlp_forward(x, prep, *, tm_target=512, out_dtype=None):
    """x: (..., C).  prep: output of prepare_params (padded bf16 weights)."""
    orig_shape = x.shape
    C = orig_shape[-1]
    out_dtype = out_dtype or x.dtype

    w1p, b1p, w2p, b2p = prep["w1p"], prep["b1p"], prep["w2p"], prep["b2p"]
    Hp = w1p.shape[1]
    Co = w2p.shape[1]

    # bf16 activations from the wrapper: halves input HBM traffic; the matmul
    # was already computed in bf16, so there is no extra precision loss.
    xm = x.reshape(-1, C).astype(jnp.bfloat16)
    M = xm.shape[0]

    tm = _choose_tm(M, tm_target)
    grid_m = pl.cdiv(M, tm)
    Mp = grid_m * tm
    if Mp != M:                                   # general shapes: pad rows, slice back
        xm = jnp.pad(xm, ((0, Mp - M), (0, 0)))

    # VMEM budget: double-buffered x/out tiles, single-buffered weights/biases,
    # plus the in-kernel f32 intermediates.  2x margin, floored at 8 MiB,
    # capped well under every generation's physical VMEM.
    out_isz = jnp.dtype(out_dtype).itemsize
    vmem_need = (2 * tm * C * 2
                 + 2 * tm * Co * out_isz
                 + (C * Hp + Hp * Co) * 2
                 + (Hp + Co) * 4
                 + tm * Hp * 4 + tm * Co * 4)
    vmem_limit = int(min(max(2 * vmem_need, 8 * 1024 * 1024), 48 * 1024 * 1024))

    out = pl.pallas_call(
        mlp_kernel,
        out_shape=jax.ShapeDtypeStruct((Mp, Co), out_dtype),
        grid=(grid_m,),
        in_specs=[
            # activations: tiled over rows, lane-dense on C
            pl.BlockSpec((tm, C), lambda i: (i, 0)),
            # constant blocks: same tile every step -> single-buffer them
            pl.BlockSpec((C, Hp), lambda i: (0, 0), pipeline_mode=pl.Buffered(1)),
            pl.BlockSpec((1, Hp), lambda i: (0, 0), pipeline_mode=pl.Buffered(1)),
            pl.BlockSpec((Hp, Co), lambda i: (0, 0), pipeline_mode=pl.Buffered(1)),
            pl.BlockSpec((1, Co), lambda i: (0, 0), pipeline_mode=pl.Buffered(1)),
        ],
        out_specs=pl.BlockSpec((tm, Co), lambda i: (i, 0)),
        compiler_params=pltpu.CompilerParams(
            dimension_semantics=("parallel",),
            vmem_limit_bytes=vmem_limit),
    )(xm, w1p, b1p, w2p, b2p)

    if Mp != M:
        out = out[:M]
    return out.reshape(orig_shape[:-1] + (Co,))


def init_params(key, in_features, hidden_features):
    ks = jax.random.split(key, 4)
    s = 0.05
    return {
        "w1": s * jax.random.normal(ks[0], (in_features, hidden_features), jnp.float32),
        "b1": 0.1 * jax.random.normal(ks[1], (hidden_features,), jnp.float32),
        "w2": s * jax.random.normal(ks[2], (hidden_features, in_features), jnp.float32),
        "b2": 0.1 * jax.random.normal(ks[3], (in_features,), jnp.float32),
    }


def reference(x, params):
    """Pure-JAX fp32 mirror of the PyTorch Mlp.forward (eval mode, drop=0)."""
    h = jnp.maximum(x @ params["w1"] + params["b1"], 0.0)
    return h @ params["w2"] + params["b2"]


if __name__ == "__main__":
    B, N, C = 2, 128, 128            # tokens (B, N, C); hidden = C // 4 = 32
    key = jax.random.PRNGKey(0)
    kx, kp = jax.random.split(key)
    x = jax.random.normal(kx, (B, N, C), jnp.float32)
    params = init_params(kp, C, C // 4)

    prep = prepare_params(params)    # one-time padded/bf16 weights (hoisted)
    fwd = jax.jit(mlp_forward)       # out_dtype=jnp.bfloat16 available if downstream allows

    out = jax.block_until_ready(fwd(x, prep))

    ref = reference(x, params)
    np.testing.assert_allclose(np.asarray(out), np.asarray(ref),
                               rtol=2e-2, atol=2e-2)
    print("KERNEL_OK")
</pallas_src>

<mosaic_0001>
module attributes {stable_mosaic.version = 11 : i64} {
  func.func @mlp_kernel(%arg0: i32, %arg1: memref<128x128xbf16, #tpu.memory_space<vmem>>, %arg2: memref<128x128xbf16, #tpu.memory_space<vmem>>, %arg3: memref<1x128xf32, #tpu.memory_space<vmem>>, %arg4: memref<128x128xbf16, #tpu.memory_space<vmem>>, %arg5: memref<1x128xf32, #tpu.memory_space<vmem>>, %arg6: memref<128x128xf32, #tpu.memory_space<vmem>>) attributes {dimension_semantics = [#tpu.dimension_semantics<parallel>], iteration_bounds = array<i64: 2>, scalar_prefetch = 0 : i64, scratch_operands = 0 : i64, tpu.core_type = #tpu.core_type<tc>, window_params = [{transform_indices = @transform_0, window_bounds = array<i64: 128, 128>}, {pipeline_mode = #tpu.pipeline_mode<synchronous>, transform_indices = @transform_1, window_bounds = array<i64: 128, 128>}, {pipeline_mode = #tpu.pipeline_mode<synchronous>, transform_indices = @transform_2, window_bounds = array<i64: 1, 128>}, {pipeline_mode = #tpu.pipeline_mode<synchronous>, transform_indices = @transform_3, window_bounds = array<i64: 128, 128>}, {pipeline_mode = #tpu.pipeline_mode<synchronous>, transform_indices = @transform_4, window_bounds = array<i64: 1, 128>}, {transform_indices = @transform_5, window_bounds = array<i64: 128, 128>}]} {
    %c0 = arith.constant 0 : index
    %c0_0 = arith.constant 0 : index
    %0 = vector.load %arg1[%c0, %c0_0] : memref<128x128xbf16, #tpu.memory_space<vmem>>, vector<128x128xbf16>
    %c0_1 = arith.constant 0 : index
    %c0_2 = arith.constant 0 : index
    %1 = vector.load %arg2[%c0_1, %c0_2] : memref<128x128xbf16, #tpu.memory_space<vmem>>, vector<128x128xbf16>
    %cst = arith.constant dense<0.000000e+00> : vector<128x128xf32>
    %2 = tpu.matmul %0, %1, %cst {dimension_numbers = #tpu.dot_dimension_numbers<[1], [0], [0], [1], [0, 0, 1, 1], [], []>} : vector<128x128xbf16>, vector<128x128xbf16>, vector<128x128xf32> -> vector<128x128xf32>
    %c0_3 = arith.constant 0 : index
    %c0_4 = arith.constant 0 : index
    %3 = vector.load %arg3[%c0_3, %c0_4] : memref<1x128xf32, #tpu.memory_space<vmem>>, vector<1x128xf32>
    %4 = vector.broadcast %3 : vector<1x128xf32> to vector<128x128xf32>
    %5 = arith.addf %2, %4 : vector<128x128xf32>
    %cst_5 = arith.constant 0.000000e+00 : f32
    %6 = vector.broadcast %cst_5 : f32 to vector<128x128xf32>
    %7 = arith.maximumf %5, %6 : vector<128x128xf32>
    %8 = arith.truncf %7 : vector<128x128xf32> to vector<128x128xbf16>
    %c0_6 = arith.constant 0 : index
    %c0_7 = arith.constant 0 : index
    %9 = vector.load %arg4[%c0_6, %c0_7] : memref<128x128xbf16, #tpu.memory_space<vmem>>, vector<128x128xbf16>
    %cst_8 = arith.constant dense<0.000000e+00> : vector<128x128xf32>
    %10 = tpu.matmul %8, %9, %cst_8 {dimension_numbers = #tpu.dot_dimension_numbers<[1], [0], [0], [1], [0, 0, 1, 1], [], []>} : vector<128x128xbf16>, vector<128x128xbf16>, vector<128x128xf32> -> vector<128x128xf32>
    %c0_9 = arith.constant 0 : index
    %c0_10 = arith.constant 0 : index
    %11 = vector.load %arg5[%c0_9, %c0_10] : memref<1x128xf32, #tpu.memory_space<vmem>>, vector<1x128xf32>
    %12 = vector.broadcast %11 : vector<1x128xf32> to vector<128x128xf32>
    %13 = arith.addf %10, %12 : vector<128x128xf32>
    %c0_11 = arith.constant 0 : index
    %c0_12 = arith.constant 0 : index
    %14 = vector.load %arg6[%c0_11, %c0_12] : memref<128x128xf32, #tpu.memory_space<vmem>>, vector<128x128xf32>
    tpu.vector_store %arg6[%c0_11, %c0_12], %13 {strides = array<i32>} : memref<128x128xf32, #tpu.memory_space<vmem>>, vector<128x128xf32>,
    return
  }
  func.func @transform_0(%arg0: i32) -> (i32, i32) {
    %c0_i32 = arith.constant 0 : i32
    %c0_i32_0 = arith.constant 0 : i32
    return %arg0, %c0_i32 : i32, i32
  }
  func.func @transform_1(%arg0: i32) -> (i32, i32) {
    %c0_i32 = arith.constant 0 : i32
    %c0_i32_0 = arith.constant 0 : i32
    %c0_i32_1 = arith.constant 0 : i32
    return %c0_i32, %c0_i32_0 : i32, i32
  }
  func.func @transform_2(%arg0: i32) -> (i32, i32) {
    %c0_i32 = arith.constant 0 : i32
    %c0_i32_0 = arith.constant 0 : i32
    %c0_i32_1 = arith.constant 0 : i32
    return %c0_i32, %c0_i32_0 : i32, i32
  }
  func.func @transform_3(%arg0: i32) -> (i32, i32) {
    %c0_i32 = arith.constant 0 : i32
    %c0_i32_0 = arith.constant 0 : i32
    %c0_i32_1 = arith.constant 0 : i32
    return %c0_i32, %c0_i32_0 : i32, i32
  }
  func.func @transform_4(%arg0: i32) -> (i32, i32) {
    %c0_i32 = arith.constant 0 : i32
    %c0_i32_0 = arith.constant 0 : i32
    %c0_i32_1 = arith.constant 0 : i32
    return %c0_i32, %c0_i32_0 : i32, i32
  }
  func.func @transform_5(%arg0: i32) -> (i32, i32) {
    %c0_i32 = arith.constant 0 : i32
    %c0_i32_0 = arith.constant 0 : i32
    return %arg0, %c0_i32 : i32, i32
  }
}

</mosaic_0001>

<bundles_post_ra>
// kernel: mlp_forward.1
= control target key start
LH: loop header
LB: loop body
LE: loop exit
PB: predicated region body
PF: predicated region fallthrough
CT: control target
= control target key end

     0   :  { %10 = vsyncpa [#allocation3], 0  ;;  %s1226_s0 = inlined_call_operand.vmem [shape: bf16[256,128], index: 0, kind: input, shape index: {}]   ;;  %s1227_s1 = inlined_call_operand.vmem [shape: bf16[128,128], index: 1, kind: input, shape index: {}]   ;;  %s1228_s2 = inlined_call_operand.vmem [shape: f32[1,128], index: 2, kind: input, shape index: {}]   ;;  %s1229_s3 = inlined_call_operand.vmem [shape: bf16[128,128], index: 3, kind: input, shape index: {}]   ;;  %s1230_s4 = inlined_call_operand.vmem [shape: f32[1,128], index: 4, kind: input, shape index: {}]   ;;  %s1231_s5 = inlined_call_operand.hbm [shape: f32[256,128], index: 5, kind: output, shape index: {}]  }
   0x1   :  { %12 = vsyncpa [#allocation3 + $0x1], 0  ;;  %s1038_s18 = smov 0   ;;  %s1040_s19 = smov 0  }
   0x2   :  { %s1042_s20 = smov 0   ;;  %s1044_s21 = smov 0  }
   0x3 LB: > { %s1059_s22 = sadd.s32 4294967295, %s1003_s21   ;;  %s743_s23 = sadd.s32 4294967294, %s1003_s21   ;;  %s1003_s21 = sphi %s1044_s21, %s1237_s21   ;;  %s999_s20 = sphi %s1042_s20, %s1236_s20   ;;  %s995_s19 = sphi %s1040_s19, %s1235_s19   ;;  %s991_s18 = sphi %s1038_s18, %s1234_s18  }
   0x4   : > { %s1063_s24 = sadd.s32 1, %s1003_s21   ;;  %s135_s25 = sadd.s32 1, %s999_s20 }
   0x5   : > { %s132_s26 = ssub.s32 %s1003_s21, %s1063_s24  ;;  %p145_p0 = scmp.ne.s32.totalorder %s999_s20, %s995_s19 }
   0x6   : > { %p133_p1 = scmp.eq.s32.totalorder %s132_s26, 0  ;;  %p146_p2 = scmp.eq.s32.totalorder %s1059_s22, 1 }
   0x7   : > { %p151_p3 = scmp.ne.s32.totalorder %s995_s19, %s991_s18  ;;  %p152_p4 = scmp.eq.s32.totalorder %s743_s23, 1 }
   0x8   : > { %s1074_s27 = scalar_select %p133_p1, %s999_s20, %s135_s25  }
   0x9   : > { %p1076_p5 = por %p146_p2, %p145_p0  ;;  %p1080_p6 = por %p152_p4, %p151_p3 }
   0xa   : > { %p746_p7 = scmp.ge.s32.totalorder %s1003_s21, 1  ;;  %p191_p8 = scmp.lt.s32.totalorder %s1003_s21, 3 }
   0xc   : > { %p192_p9 = pnand %p746_p7, %p191_p8 }
   0xd   : > { %s748_s7 = sshll.u32 (!%p192_p9), %s1059_s22, 4  ;;  %s781_s23 = sshll.u32 (!%p192_p9), %s1059_s22, 11 }
   0xe   : > { %195 = sbr.rel (%p192_p9) target bundleno = 497 (0x1f1), region = 40  ;;  %p220_p10 = scmp.lt.s32.totalorder (!%p192_p9), %s748_s7, 31 }
   0xf   : > { %s1178_s6 = scalar_lea.hbm (!%p192_p9), %s1231_s5, %s781_s23  ;;  %s1005_s8 = smov (!%p192_p9), [#allocation2]  }
  0x10   : > { %s947_s9 = sshll.u32 (!%p192_p9), %s1005_s8, 4  ;;  %s948_s9 = int_to_ptr.vmem [resolvable:$false] %s947_s9 }
  0x11   : > { %s949_s10 = scalar_lea.vmem (!%p192_p9), %s948_s9, 4096 }
  0x13   : > { %v919_v0 = vld [vmem:[%s1227_s1 + $0x38] sm:$0xff]   ;;  %v920_v1 = vld [vmem:[%s1227_s1 + $0x30] sm:$0xff]   ;;  %s1239_s7 = smov (!%p220_p10, %s748_s7), 31  ;;  %v921_v2 = vld [vmem:[%s1227_s1 + $0x28] sm:$0xff]  }
  0x14   : > { %814 = vmatprep.subr.bf16.mxu0 %v919_v0  ;;  %s749_s12 = sshll.u32 %s1239_s7, 2  ;;  %v922_v3 = vld [vmem:[%s1227_s1 + $0x20] sm:$0xff]   ;;  %v923_v5 = vld [vmem:[%s1227_s1 + $0x18] sm:$0xff]   ;;  %v924_v6 = vld [vmem:[%s1227_s1 + $0x10] sm:$0xff]  }
  0x15   : > { %815 = vmatpush3.bf16.msra.mxu0 %v919_v0  ;;  %s1099_s15 = scalar_lea.vmem %s1226_s0, %s749_s12  ;;  %v935_v7 = vld [vmem:[%s1229_s3 + $0x38] sm:$0xff]   ;;  %v936_v8 = vld [vmem:[%s1229_s3 + $0x30] sm:$0xff]   ;;  %v925_v9 = vld [vmem:[%s1227_s1 + $0x8] sm:$0xff]   ;;  %s216_s12 = sand.u32 1, %s995_s19  }
  0x16   : > { %816 = vmatprep.subr.bf16.mxu0 %v920_v1  ;;  %v927_v4 = vld [vmem:[%s1099_s15] sm:$0xff]   ;;  %846 = vmatprep.subr.bf16.mxu1 %v935_v7  ;;  %v937_v10 = vld [vmem:[%s1229_s3 + $0x28] sm:$0xff]   ;;  %v939_v13 = vld [vmem:[%s1229_s3 + $0x18] sm:$0xff]   ;;  %s747_s13 = sshll.u32 %s216_s12, 7  ;;  %s1186_s22 = scalar_lea.sflag [#allocation3], %s216_s12 }
  0x17   : > { %830 = vmatprep.mubr.bf16.mxu0 %v927_v4  ;;  %847 = vmatpush3.bf16.msra.mxu1 %v935_v7  ;;  %v926_v11 = vld [vmem:[%s1227_s1] sm:$0xff]   ;;  %v928_v14 = vld [vmem:[%s1099_s15 + $0x8] sm:$0xff]   ;;  %v929_v15 = vld [vmem:[%s1099_s15 + $0x10] sm:$0xff]   ;;  %s1157_s17 = scalar_lea.vmem [#allocation2], %s747_s13 }
  0x18   : > { %848 = vmatprep.subr.bf16.mxu1 %v936_v8  ;;  %v938_v12 = vld [vmem:[%s1229_s3 + $0x20] sm:$0xff]   ;;  %v930_v16 = vld [vmem:[%s1099_s15 + $0x18] sm:$0xff]   ;;  %v932_v18 = vld [vmem:[%s1099_s15 + $0x28] sm:$0xff]   ;;  %s681_s25 = sshll.u32 %s1157_s17, 4  ;;  %s1180_s25 = int_to_ptr.vmem [resolvable:$true] %s681_s25 }
  0x19   : > { %817 = vmatpush3.bf16.msra.mxu0 %v920_v1  ;;  %v931_v17 = vld [vmem:[%s1099_s15 + $0x20] sm:$0xff]   ;;  %v933_v19 = vld [vmem:[%s1099_s15 + $0x30] sm:$0xff]   ;;  %v934_v20 = vld [vmem:[%s1099_s15 + $0x38] sm:$0xff]   ;;  %s943_s7 = scalar_lea.vmem %s1180_s25, 2048  ;;  %p950_p0 = scmp.lt.s32.totalorder %s1180_s25, %s948_s9 }
  0x1a   : > { %818 = vmatprep.subr.bf16.mxu0 %v921_v2  ;;  %v940_v21 = vld [vmem:[%s1229_s3 + $0x10] sm:$0xff]   ;;  %v941_v22 = vld [vmem:[%s1229_s3 + $0x8] sm:$0xff]   ;;  %v942_v23 = vld [vmem:[%s1229_s3] sm:$0xff]   ;;  %p944_p11 = scmp.ne.s32.totalorder %s1180_s25, %s943_s7  ;;  %p951_p1 = scmp.lt.s32.totalorder %s949_s10, %s943_s7 }
  0x1b   : > { %849 = vmatpush3.bf16.msra.mxu1 %v936_v8  ;;  %v750_v26 = vld [vmem:[%s1228_s2] ss:$0 sm:$0xff] }
  0x1c   : > { %850 = vmatprep.subr.bf16.mxu1 %v937_v10  ;;  %p945_p12 = pnand %p944_p11, %p1076_p5  ;;  %p952_p2 = por %p951_p1, %p950_p0 }
  0x1d   : > { %819 = vmatpush3.bf16.msra.mxu0 %v921_v2 }
  0x1e   : > { %820 = vmatprep.subr.bf16.mxu0 %v922_v3  ;;  %p946_p13 = pneg %p945_p12 }
  0x1f   : > { %851 = vmatpush3.bf16.msra.mxu1 %v937_v10 }
  0x20   : > { %852 = vmatprep.subr.bf16.mxu1 %v938_v12  ;;  %p953_p3 = pnand %p952_p2, %p946_p13 }
  0x21   : > { %821 = vmatpush3.bf16.msra.mxu0 %v922_v3 }
  0x22   : > { %822 = vmatprep.subr.bf16.mxu0 %v923_v5 }
  0x23   : > { %853 = vmatpush3.bf16.msra.mxu1 %v938_v12 }
  0x24   : > { %854 = vmatprep.subr.bf16.mxu1 %v939_v13 }
  0x25   : > { %823 = vmatpush3.bf16.msra.mxu0 %v923_v5 }
  0x26   : > { %824 = vmatprep.subr.bf16.mxu0 %v924_v6 }
  0x27   : > { %855 = vmatpush3.bf16.msra.mxu1 %v939_v13 }
  0x28   : > { %856 = vmatprep.subr.bf16.mxu1 %v940_v21 }
  0x29   : > { %825 = vmatpush3.bf16.msra.mxu0 %v924_v6 }
  0x2a   : > { %826 = vmatprep.subr.bf16.mxu0 %v925_v9 }
  0x2b   : > { %857 = vmatpush3.bf16.msra.mxu1 %v940_v21 }
  0x2c   : > { %858 = vmatprep.subr.bf16.mxu1 %v941_v22 }
  0x2d   : > { %827 = vmatpush3.bf16.msra.mxu0 %v925_v9 }
  0x2e   : > { %828 = vmatprep.subr.bf16.mxu0 %v926_v11 }
  0x2f   : > { %859 = vmatpush3.bf16.msra.mxu1 %v941_v22 }
  0x30   : > { %860 = vmatprep.subr.bf16.mxu1 %v942_v23 }
  0x31   : > { %829 = vmatpush3.bf16.msra.mxu0 %v926_v11 }
  0x33   : > { %861 = vmatpush3.bf16.msra.mxu1 %v942_v23 }
  0x34   : > { %831 = vmatmul.mubr.bf16.vlgmr.msra.gmra.mxu0 %v928_v14 }
  0x35   : > { %834 = vmatprep.mubr.bf16.mxu0 %v929_v15 }
  0x3c   : > { %835 = vmatmul.mubr.bf16.gmra.mxu0 %v930_v16 }
  0x3d   : > { %838 = vmatprep.mubr.bf16.mxu0 %v931_v17  ;;  %v767_v17 = vld [vmem:[%s1230_s4] ss:$0 sm:$0xff] }
  0x44   : > { %839 = vmatmul.mubr.bf16.gmra.mxu0 %v932_v18 }
  0x45   : > { %842 = vmatprep.mubr.bf16.mxu0 %v933_v19 }
  0x4c   : > { %843 = vmatmul.mubr.bf16.gmra.mxu0 %v934_v20 }
  0xf4   : > { %v832_v24 = vpop.f32.mrf.mxu0 }
  0xf5   : > { %v405_v30 = vadd.f32 %v832_v24, %v750_v26 }
  0xf6   : > { %v396_v25 = vpop.f32.mrf.mxu0 }
  0xf7   : > { %v397_v28 = vadd.f32 %v750_v26, %v396_v25  ;;  %v461_v37 = vmax.f32 %v405_v30, 0.0 }
  0xf8   : > { %v833_v27 = vpop.f32.mrf.mxu0 }
  0xf9   : > { %v408_v29 = vadd.f32 %v833_v27, %v750_v26  ;;  %v459_v35 = vmax.f32 %v397_v28, 0.0 }
  0xfa   : > { %v399_v31 = vpop.f32.mrf.mxu0 }
  0xfb   : > { %v400_v32 = vadd.f32 %v750_v26, %v399_v31  ;;  %v462_v33 = vmax.f32 %v408_v29, 0.0 }
  0xfc   : > { %v836_v34 = vpop.f32.mrf.mxu0 }
  0xfd   : > { %v460_v36 = vmax.f32 %v400_v32, 0.0  ;;  %v476_v40 = vpack.c.bf16 %v462_v33, %v461_v37  ;;  %v421_v44 = vadd.f32 %v836_v34, %v750_v26 }
  0xfe   : > { %v412_v38 = vpop.f32.mrf.mxu0 }
  0xff   : > { %v475_v39 = vpack.c.bf16 %v460_v36, %v459_v35  ;;  %v413_v42 = vadd.f32 %v750_v26, %v412_v38  ;;  %v465_v51 = vmax.f32 %v421_v44, 0.0 }
 0x100   : > { %v837_v41 = vpop.f32.mrf.mxu0 }
 0x101   : > { %v424_v43 = vadd.f32 %v837_v41, %v750_v26  ;;  %862 = vmatprep.mubr.bf16.mxu1 %v475_v39  ;;  %v463_v49 = vmax.f32 %v413_v42, 0.0 }
 0x102   : > { %v415_v45 = vpop.f32.mrf.mxu0  ;;  %863 = vmatmul.mubr.bf16.vlgmr.msra.gmra.mxu1 %v476_v40 }
 0x103   : > { %v416_v46 = vadd.f32 %v750_v26, %v415_v45  ;;  %v466_v47 = vmax.f32 %v424_v43, 0.0 }
 0x104   : > { %v840_v48 = vpop.f32.mrf.mxu0 }
 0x105   : > { %v464_v50 = vmax.f32 %v416_v46, 0.0  ;;  %v478_v54 = vpack.c.bf16 %v466_v47, %v465_v51  ;;  %v437_v58 = vadd.f32 %v840_v48, %v750_v26 }
 0x106   : > { %v428_v52 = vpop.f32.mrf.mxu0 }
 0x107   : > { %v477_v53 = vpack.c.bf16 %v464_v50, %v463_v49  ;;  %v429_v56 = vadd.f32 %v750_v26, %v428_v52  ;;  %v469_v1 = vmax.f32 %v437_v58, 0.0 }
 0x108   : > { %v841_v55 = vpop.f32.mrf.mxu0 }
 0x109   : > { %v440_v57 = vadd.f32 %v841_v55, %v750_v26  ;;  %866 = vmatprep.mubr.bf16.mxu1 %v477_v53  ;;  %v467_v63 = vmax.f32 %v429_v56, 0.0 }
 0x10a   : > { %v431_v59 = vpop.f32.mrf.mxu0  ;;  %867 = vmatmul.mubr.bf16.gmra.mxu1 %v478_v54 }
 0x10b   : > { %v432_v60 = vadd.f32 %v750_v26, %v431_v59  ;;  %v470_v61 = vmax.f32 %v440_v57, 0.0 }
 0x10c   : > { %v844_v62 = vpop.f32.mrf.mxu0 }
 0x10d   : > { %v468_v0 = vmax.f32 %v432_v60, 0.0  ;;  %v480_v4 = vpack.c.bf16 %v470_v61, %v469_v1  ;;  %v453_v8 = vadd.f32 %v844_v62, %v750_v26 }
 0x10e   : > { %v444_v2 = vpop.f32.mrf.mxu0 }
 0x10f   : > { %v479_v3 = vpack.c.bf16 %v468_v0, %v467_v63  ;;  %v445_v6 = vadd.f32 %v750_v26, %v444_v2  ;;  %v473_v14 = vmax.f32 %v453_v8, 0.0 }
 0x110   : > { %v845_v5 = vpop.f32.mrf.mxu0 }
 0x111   : > { %v456_v7 = vadd.f32 %v845_v5, %v750_v26  ;;  %870 = vmatprep.mubr.bf16.mxu1 %v479_v3  ;;  %v471_v12 = vmax.f32 %v445_v6, 0.0 }
 0x112   : > { %v447_v9 = vpop.f32.mrf.mxu0  ;;  %871 = vmatmul.mubr.bf16.gmra.mxu1 %v480_v4 }
 0x113   : > { %v448_v10 = vadd.f32 %v750_v26, %v447_v9  ;;  %v474_v11 = vmax.f32 %v456_v7, 0.0 }
 0x115   : > { %v472_v13 = vmax.f32 %v448_v10, 0.0  ;;  %v482_v16 = vpack.c.bf16 %v474_v11, %v473_v14 }
 0x117   : > { %v481_v15 = vpack.c.bf16 %v472_v13, %v471_v12 }
 0x119   : > { %874 = vmatprep.mubr.bf16.mxu1 %v481_v15 }
 0x11a   : > { %875 = vmatmul.mubr.bf16.gmra.mxu1 %v482_v16 }
 0x1c2   : > { %v864_v18 = vpop.f32.mrf.mxu1 }
 0x1c3   : > { %v597_v19 = vadd.f32 %v864_v18, %v767_v17 }
 0x1c4   : > { %v588_v20 = vpop.f32.mrf.mxu1 }
 0x1c5   : > { %653 = vst [vmem:[%s1157_s17 + $0x10] sm:$0xff] %v597_v19  ;;  %v589_v21 = vadd.f32 %v767_v17, %v588_v20 }
 0x1c6   : > { %v865_v22 = vpop.f32.mrf.mxu1 }
 0x1c7   : > { %651 = vst [vmem:[%s1157_s17] sm:$0xff] %v589_v21  ;;  %v600_v23 = vadd.f32 %v865_v22, %v767_v17 }
 0x1c8   : > { %v591_v24 = vpop.f32.mrf.mxu1 }
 0x1c9   : > { %654 = vst [vmem:[%s1157_s17 + $0x18] sm:$0xff] %v600_v23  ;;  %v592_v25 = vadd.f32 %v767_v17, %v591_v24 }
 0x1ca   : > { %v868_v26 = vpop.f32.mrf.mxu1 }
 0x1cb   : > { %652 = vst [vmem:[%s1157_s17 + $0x8] sm:$0xff] %v592_v25  ;;  %v613_v27 = vadd.f32 %v868_v26, %v767_v17 }
 0x1cc   : > { %v604_v28 = vpop.f32.mrf.mxu1 }
 0x1cd   : > { %657 = vst [vmem:[%s1157_s17 + $0x30] sm:$0xff] %v613_v27  ;;  %v605_v29 = vadd.f32 %v767_v17, %v604_v28 }
 0x1ce   : > { %v869_v30 = vpop.f32.mrf.mxu1 }
 0x1cf   : > { %655 = vst [vmem:[%s1157_s17 + $0x20] sm:$0xff] %v605_v29  ;;  %v616_v31 = vadd.f32 %v869_v30, %v767_v17 }
 0x1d0   : > { %v607_v32 = vpop.f32.mrf.mxu1 }
 0x1d1   : > { %658 = vst [vmem:[%s1157_s17 + $0x38] sm:$0xff] %v616_v31  ;;  %v608_v33 = vadd.f32 %v767_v17, %v607_v32 }
 0x1d2   : > { %v872_v34 = vpop.f32.mrf.mxu1 }
 0x1d3   : > { %656 = vst [vmem:[%s1157_s17 + $0x28] sm:$0xff] %v608_v33  ;;  %v629_v35 = vadd.f32 %v872_v34, %v767_v17 }
 0x1d4   : > { %v620_v36 = vpop.f32.mrf.mxu1 }
 0x1d5   : > { %661 = vst [vmem:[%s1157_s17 + $0x50] sm:$0xff] %v629_v35  ;;  %v621_v37 = vadd.f32 %v767_v17, %v620_v36 }
 0x1d6   : > { %v873_v38 = vpop.f32.mrf.mxu1 }
 0x1d7   : > { %659 = vst [vmem:[%s1157_s17 + $0x40] sm:$0xff] %v621_v37  ;;  %v632_v39 = vadd.f32 %v873_v38, %v767_v17 }
 0x1d8   : > { %v623_v40 = vpop.f32.mrf.mxu1 }
 0x1d9   : > { %662 = vst [vmem:[%s1157_s17 + $0x58] sm:$0xff] %v632_v39  ;;  %v624_v41 = vadd.f32 %v767_v17, %v623_v40 }
 0x1da   : > { %v876_v42 = vpop.f32.mrf.mxu1 }
 0x1db   : > { %660 = vst [vmem:[%s1157_s17 + $0x48] sm:$0xff] %v624_v41  ;;  %v645_v43 = vadd.f32 %v876_v42, %v767_v17 }
 0x1dc   : > { %v636_v44 = vpop.f32.mrf.mxu1 }
 0x1dd   : > { %665 = vst [vmem:[%s1157_s17 + $0x70] sm:$0xff] %v645_v43  ;;  %v637_v45 = vadd.f32 %v767_v17, %v636_v44 }
 0x1de   : > { %v877_v46 = vpop.f32.mrf.mxu1 }
 0x1df   : > { %663 = vst [vmem:[%s1157_s17 + $0x60] sm:$0xff] %v637_v45  ;;  %v648_v47 = vadd.f32 %v877_v46, %v767_v17 }
 0x1e0   : > { %v639_v48 = vpop.f32.mrf.mxu1 }
 0x1e1   : > { %666 = vst [vmem:[%s1157_s17 + $0x78] sm:$0xff] %v648_v47  ;;  %v640_v49 = vadd.f32 %v767_v17, %v639_v48 }
 0x1e3   : > { %664 = vst [vmem:[%s1157_s17 + $0x68] sm:$0xff] %v640_v49 }
 0x1e4   : > { %956 = shalt.err (!%p953_p3)
}
 0x1e5   : > { %s957_s15 = scalar_lea.hbm %s1178_s6, 2048  ;;  %s961_s13 = scalar_lea.hbm %s1231_s5, 4096 }
 0x1e6   : > { %p958_p4 = scmp.ne.s32.totalorder %s1178_s6, %s957_s15  ;;  %p962_p9 = scmp.lt.s32.totalorder %s1178_s6, %s1231_s5 }
 0x1e7   : > { %p963_p10 = scmp.lt.s32.totalorder %s961_s13, %s957_s15 }
 0x1e8   : > { %p959_p7 = pnand %p958_p4, %p1076_p5 }
 0x1e9   : > { %p964_p11 = por %p963_p10, %p962_p9 }
 0x1ea   : > { %p960_p8 = pneg %p959_p7 }
 0x1ec   : > { %p965_p12 = pnand %p964_p11, %p960_p8 }
 0x1ee   : > { %968 = shalt.err (!%p965_p12)
}
 0x1ef   : > { %s1006_s17 = smov 128   ;;  %s1007_s23 = smov 8  }
 0x1f0   : > { %878 = dma.vmem_to_hbm [thread:$0]  (%p1076_p5), %s1180_s25, 2048, %s1178_s6, %s1186_s22, %s1006_s17, %s1006_s17, %s1007_s23  }
 0x1f1 PF: > { %p884_p13 = scmp.ge.s32.totalorder %s1003_s21, 2  ;;  %s696_s26 = sand.u32 1, %s991_s18  }
 0x1f2   : > { %s697_s30 = scalar_lea.sflag [#allocation3], %s696_s26 }
 0x1f3   : > { %p881_p0 = pnand %p884_p13, %p1080_p6 }
 0x1f5   : > { %p882_p1 = pneg %p881_p0 }
 0x1f7   : > { %986 = dma.done.wait (%p882_p1), %s697_s30, 2048  }
 0x1f8   : > { %988 = vsyncadd (%p882_p1), %s697_s30, 4294965248  ;;  %p15_p2 = scmp.ge.s32.totalorder %s1063_s24, 4   ;;  %s1234_s18 = smov %s995_s19 }
 0x1f9   : > { %s1235_s19 = smov %s999_s20  ;;  %s1236_s20 = smov %s1074_s27 }
 0x1fa   : > { %s1237_s21 = smov %s1063_s24  ;;  %17 = sbr.rel (!%p15_p2) target bundleno = 3 (0x3), region = 75 }
 0x1ff   :  { %702 = vsyncpa [#allocation3], 1 }
 0x200   :  { %704 = vsyncpa [#allocation3 + $0x1], 1 }

</bundles_post_ra>
